<compile_context>
chip_gen: v6e
topology: v6e:2x2x1
jax: 0.10.0
libtpu: 0.0.40
codegen_flags: <defaults>
</compile_context>

<pallas_src>
import functools

import jax
import jax.numpy as jnp
from jax.experimental import pallas as pl
from jax.experimental.pallas import tpu as pltpu

_LANE = 128


def _vmem_budget_bytes():
    """~45% of physical VMEM (generation-aware); conservative fallback."""
    try:
        cap = int(pltpu.get_tpu_info().vmem_capacity_bytes)
    except Exception:
        cap = 64 << 20  # smallest per-core VMEM among v5e/v6e/v7x
    return int(max(16 << 20, min(int(cap * 0.45), 96 << 20)))


def _pick_hw_tile(hw_pad, t_max):
    """Largest multiple-of-128 divisor of hw_pad that is <= t_max (>= 128)."""
    t_max = max(_LANE, (min(int(t_max), hw_pad) // _LANE) * _LANE)
    if hw_pad <= t_max:
        return hw_pad
    t = t_max
    while t >= _LANE:
        if hw_pad % t == 0:
            return t
        t -= _LANE
    return _LANE


def _accumulate_pools(y, sum_sc, max_sc, *, tile, t, hw, need_mask):
    """Accumulate (Cout, 128) partial sum/max pools from a (Cout, tile) y tile.

    Only VPU adds/max here; the 128->1 cross-lane (XLU) reduction is deferred
    to the per-batch finalize branch.
    """
    y_max = y
    if need_mask:
        lane = jax.lax.broadcasted_iota(jnp.int32, y.shape, 1) + t * tile
        y_max = jnp.where(lane < hw, y, -jnp.inf)
        # Sum needs no mask: padded x columns are zero, so y columns are zero.
    ps = y[:, 0:_LANE]
    pm = y_max[:, 0:_LANE]
    for c in range(1, tile // _LANE):
        sl = slice(c * _LANE, (c + 1) * _LANE)
        ps = ps + y[:, sl]
        pm = jnp.maximum(pm, y_max[:, sl])
    sum_sc[...] += ps
    max_sc[...] = jnp.maximum(max_sc[...], pm)


def _compute_gate(sum_sc, max_sc, w11t_ref, w12_ref, w21t_ref, w22_ref, *, hw):
    """Final 128->1 pool reduce + both tiny MLPs + sigmoid -> (Cout, 1) f32.

    The MLPs are VPU broadcast-mul + sublane/lane reductions so there are no
    degenerate (M=1 / N=1) MXU matmuls and no in-kernel transposes.
    """
    avg = jnp.sum(sum_sc[...], axis=1, keepdims=True) * (1.0 / hw)          # (Cout, 1)
    mx = jnp.max(max_sc[...], axis=1, keepdims=True)                        # (Cout, 1)
    h_avg = jnp.maximum(
        jnp.sum(w11t_ref[...] * avg, axis=0, keepdims=True), 0.0)           # (1, Cr)
    h_max = jnp.maximum(
        jnp.sum(w21t_ref[...] * mx, axis=0, keepdims=True), 0.0)            # (1, Cr)
    avg_out = jnp.sum(w12_ref[...] * h_avg, axis=1, keepdims=True)          # (Cout, 1)
    max_out = jnp.sum(w22_ref[...] * h_max, axis=1, keepdims=True)          # (Cout, 1)
    return jax.nn.sigmoid(avg_out + max_out)


# --------------------------- fused single-pass kernel ------------------------

def _fused_kernel(x_ref, wconv_ref, w11t_ref, w12_ref, w21t_ref, w22_ref,
                  o_ref, sum_sc, max_sc, *, tile, n_tiles, hw, need_mask):
    """y = Wconv @ x written into the resident output slab + online pooling;
    gate computed and applied in place on the last HW tile.

    x_ref:  (1, Cin, T)      f32 (cast to bf16 in-kernel)
    o_ref:  (1, Cout, HWpad) resident across the HW-tile grid axis
    """
    t = pl.program_id(1)

    @pl.when(t == 0)
    def _init():
        sum_sc[...] = jnp.zeros_like(sum_sc)
        max_sc[...] = jnp.full_like(max_sc, -jnp.inf)

    xb = x_ref[0].astype(jnp.bfloat16)                                 # (Cin, T)
    y = jnp.dot(wconv_ref[...], xb, preferred_element_type=jnp.float32)  # (Cout, T)
    _accumulate_pools(y, sum_sc, max_sc, tile=tile, t=t, hw=hw,
                      need_mask=need_mask)

    start = pl.multiple_of(t * tile, _LANE)
    o_ref[0, :, pl.ds(start, tile)] = y.astype(o_ref.dtype)

    @pl.when(t == n_tiles - 1)
    def _finalize():
        gate = _compute_gate(sum_sc, max_sc, w11t_ref, w12_ref, w21t_ref,
                             w22_ref, hw=hw)                           # (Cout, 1)

        @pl.loop(0, n_tiles)
        def _scale(s):
            off = pl.multiple_of(s * tile, _LANE)
            blk = o_ref[0, :, pl.ds(off, tile)].astype(jnp.float32)
            o_ref[0, :, pl.ds(off, tile)] = (blk * gate).astype(o_ref.dtype)


# --------------------------- two-pass fallback kernels -----------------------

def _pool_gate_kernel(x_ref, wconv_ref, w11t_ref, w12_ref, w21t_ref, w22_ref,
                      gate_ref, sum_sc, max_sc, *, tile, hw, need_mask):
    """Pass 1: conv + pooling accumulation over HW tiles, MLPs + sigmoid at end."""
    t = pl.program_id(1)

    @pl.when(t == 0)
    def _init():
        sum_sc[...] = jnp.zeros_like(sum_sc)
        max_sc[...] = jnp.full_like(max_sc, -jnp.inf)

    xb = x_ref[0].astype(jnp.bfloat16)
    y = jnp.dot(wconv_ref[...], xb, preferred_element_type=jnp.float32)
    _accumulate_pools(y, sum_sc, max_sc, tile=tile, t=t, hw=hw,
                      need_mask=need_mask)

    @pl.when(t == pl.num_programs(1) - 1)
    def _finalize():
        gate_ref[0] = _compute_gate(
            sum_sc, max_sc, w11t_ref, w12_ref, w21t_ref, w22_ref,
            hw=hw).astype(gate_ref.dtype)


def _apply_gate_kernel(x_ref, wconv_ref, gate_ref, o_ref):
    """Pass 2: recompute y = Wconv @ x for this HW tile and apply the gate."""
    xb = x_ref[0].astype(jnp.bfloat16)
    y = jnp.dot(wconv_ref[...], xb, preferred_element_type=jnp.float32)
    o_ref[0] = (y * gate_ref[0]).astype(o_ref.dtype)


# ----------------------------------- wrapper ---------------------------------

def channel_attention(x_nchw, params, *, out_dtype=jnp.bfloat16,
                      force_two_pass=False, vmem_budget_bytes=None):
    """ChannelAttention forward.

    x_nchw: (B, Cin, H, W) float32 (kept f32 in HBM; cast to bf16 in-kernel).
    params: PyTorch-layout 1x1-conv weights squeezed to 2D:
      wconv (Cout, Cin), w11 (Cr, Cout), w12 (Cout, Cr), w21 (Cr, Cout),
      w22 (Cout, Cr).
    Returns (B, Cout, H, W) in `out_dtype` (default bf16).
    """
    B, Cin, H, W = x_nchw.shape
    HW = H * W
    wconv, w11, w12, w21, w22 = params
    Cout, Cr = wconv.shape[0], w11.shape[0]

    cdt = jnp.bfloat16
    x_item = jnp.dtype(x_nchw.dtype).itemsize
    o_item = jnp.dtype(out_dtype).itemsize
    w_item = jnp.dtype(cdt).itemsize

    # NCHW kept as-is: zero-movement reshape; no wrapper-side bf16 cast of x.
    x_flat = x_nchw.reshape(B, Cin, HW)
    HW_pad = pl.cdiv(HW, _LANE) * _LANE
    need_mask = HW_pad != HW
    if need_mask:
        # TODO(synk): the pad is one extra x pass; a masked ragged last block
        # (pl.BoundedSlice) would avoid it.
        x_flat = jnp.pad(x_flat, ((0, 0), (0, 0), (0, HW_pad - HW)))

    wconv_b = wconv.astype(cdt)          # (Cout, Cin)
    w11t_b = w11.T.astype(cdt)           # (Cout, Cr)
    w12_b = w12.astype(cdt)              # (Cout, Cr)
    w21t_b = w21.T.astype(cdt)           # (Cout, Cr)
    w22_b = w22.astype(cdt)              # (Cout, Cr)
    weight_args = (wconv_b, w11t_b, w12_b, w21t_b, w22_b)
    weight_specs = ([pl.BlockSpec((Cout, Cin), lambda b, t: (0, 0))]
                    + [pl.BlockSpec((Cout, Cr), lambda b, t: (0, 0))] * 4)

    w_bytes = (Cout * Cin + 4 * Cout * Cr) * w_item
    pool_bytes = 2 * Cout * _LANE * 4
    headroom = 2 << 20
    budget = (_vmem_budget_bytes() if vmem_budget_bytes is None
              else int(vmem_budget_bytes))

    def _cparams(semantics, need):
        return pltpu.CompilerParams(
            dimension_semantics=semantics,
            vmem_limit_bytes=int(min(budget, max(int(need), 16 << 20))))

    pool_scratch = [pltpu.VMEM((Cout, _LANE), jnp.float32),
                    pltpu.VMEM((Cout, _LANE), jnp.float32)]

    # ------------- fused single-pass path: output slab resident in VMEM ------
    fused_fixed = 2 * Cout * HW_pad * o_item + 2 * w_bytes + pool_bytes + headroom
    fused_ok = (not force_two_pass) and (
        fused_fixed + 2 * Cin * _LANE * x_item <= budget)

    if fused_ok:
        t_max = (budget - fused_fixed) // (2 * Cin * x_item)
        T = _pick_hw_tile(HW_pad, min(t_max, 16384))
        n_t = HW_pad // T
        need = fused_fixed + 2 * Cin * T * x_item

        out_flat = pl.pallas_call(
            functools.partial(_fused_kernel, tile=T, n_tiles=n_t, hw=HW,
                              need_mask=need_mask),
            out_shape=jax.ShapeDtypeStruct((B, Cout, HW_pad), out_dtype),
            grid_spec=pltpu.PrefetchScalarGridSpec(
                num_scalar_prefetch=0,
                grid=(B, n_t),
                in_specs=[pl.BlockSpec((1, Cin, T), lambda b, t: (b, 0, t))]
                         + weight_specs,
                out_specs=pl.BlockSpec((1, Cout, HW_pad), lambda b, t: (b, 0, 0)),
                scratch_shapes=pool_scratch),
            compiler_params=_cparams(("parallel", "arbitrary"), need),
            cost_estimate=pl.CostEstimate(
                flops=2 * B * HW_pad * Cin * Cout,
                transcendentals=B * Cout,
                bytes_accessed=(B * HW_pad * (Cin * x_item + Cout * o_item)
                                + w_bytes)),
        )(x_flat, *weight_args)

    # -------------------- two-pass fallback (very large HW) ------------------
    else:
        per_lane = 2 * (Cin * x_item + Cout * o_item)
        fixed = 2 * w_bytes + pool_bytes + headroom
        t_max = max(_LANE, (budget - fixed) // per_lane)
        T = _pick_hw_tile(HW_pad, min(t_max, 16384))
        n_t = HW_pad // T

        need1 = 2 * Cin * T * x_item + 2 * w_bytes + pool_bytes + headroom
        gate = pl.pallas_call(
            functools.partial(_pool_gate_kernel, tile=T, hw=HW,
                              need_mask=need_mask),
            out_shape=jax.ShapeDtypeStruct((B, Cout, 1), jnp.float32),
            grid_spec=pltpu.PrefetchScalarGridSpec(
                num_scalar_prefetch=0,
                grid=(B, n_t),
                in_specs=[pl.BlockSpec((1, Cin, T), lambda b, t: (b, 0, t))]
                         + weight_specs,
                out_specs=pl.BlockSpec((1, Cout, 1), lambda b, t: (b, 0, 0)),
                scratch_shapes=pool_scratch),
            compiler_params=_cparams(("parallel", "arbitrary"), need1),
            cost_estimate=pl.CostEstimate(
                flops=2 * B * HW_pad * Cin * Cout,
                transcendentals=B * Cout,
                bytes_accessed=(B * HW_pad * Cin * x_item + w_bytes
                                + B * Cout * 4)),
        )(x_flat, *weight_args)

        need2 = (2 * (Cin * T * x_item + Cout * T * o_item)
                 + 2 * Cout * Cin * w_item + headroom)
        out_flat = pl.pallas_call(
            _apply_gate_kernel,
            out_shape=jax.ShapeDtypeStruct((B, Cout, HW_pad), out_dtype),
            grid_spec=pltpu.PrefetchScalarGridSpec(
                num_scalar_prefetch=0,
                grid=(B, n_t),
                in_specs=[
                    pl.BlockSpec((1, Cin, T), lambda b, t: (b, 0, t)),
                    pl.BlockSpec((Cout, Cin), lambda b, t: (0, 0)),
                    pl.BlockSpec((1, Cout, 1), lambda b, t: (b, 0, 0)),
                ],
                out_specs=pl.BlockSpec((1, Cout, T), lambda b, t: (b, 0, t))),
            compiler_params=_cparams(("parallel", "parallel"), need2),
            cost_estimate=pl.CostEstimate(
                flops=2 * B * HW_pad * Cin * Cout,
                transcendentals=0,
                bytes_accessed=(B * HW_pad * (Cin * x_item + Cout * o_item)
                                + Cout * Cin * w_item + B * Cout * 4)),
        )(x_flat, wconv_b, gate)

    if need_mask:
        out_flat = out_flat[:, :, :HW]
    return out_flat.reshape(B, Cout, H, W)


# ---------------------------------- test helpers -----------------------------

def make_params(key, in_planes, out_planes, ratio=2):
    """Deterministic synthetic weights in PyTorch 1x1-conv (O, I) layout."""
    Cr = out_planes // ratio
    k = jax.random.split(key, 5)
    wconv = jax.random.normal(k[0], (out_planes, in_planes), jnp.float32) * 0.1
    w11 = jax.random.normal(k[1], (Cr, out_planes), jnp.float32) * 0.1
    w12 = jax.random.normal(k[2], (out_planes, Cr), jnp.float32) * 0.1
    w21 = jax.random.normal(k[3], (Cr, out_planes), jnp.float32) * 0.1
    w22 = jax.random.normal(k[4], (out_planes, Cr), jnp.float32) * 0.1
    return (wconv, w11, w12, w21, w22)


def reference(x_nchw, params):
    """Pure-JAX reference mirroring the PyTorch forward, with the same bf16
    rounding of inputs/weights as the kernel (f32 accumulation)."""
    wconv, w11, w12, w21, w22 = params
    xb = x_nchw.astype(jnp.bfloat16)
    y = jnp.einsum('oi,bihw->bohw', wconv.astype(jnp.bfloat16), xb,
                   preferred_element_type=jnp.float32)            # (B, Cout, H, W)
    avg = jnp.mean(y, axis=(2, 3))                                # (B, Cout)
    mx = jnp.max(y, axis=(2, 3))                                  # (B, Cout)

    hi = jax.lax.Precision.HIGHEST
    w11f = w11.astype(jnp.bfloat16).astype(jnp.float32)
    w12f = w12.astype(jnp.bfloat16).astype(jnp.float32)
    w21f = w21.astype(jnp.bfloat16).astype(jnp.float32)
    w22f = w22.astype(jnp.bfloat16).astype(jnp.float32)
    avg_out = jnp.dot(jnp.maximum(jnp.dot(avg, w11f.T, precision=hi), 0.0),
                      w12f.T, precision=hi)
    max_out = jnp.dot(jnp.maximum(jnp.dot(mx, w21f.T, precision=hi), 0.0),
                      w22f.T, precision=hi)
    gate = jax.nn.sigmoid(avg_out + max_out)[:, :, None, None]
    return y * gate


if __name__ == "__main__":
    key = jax.random.PRNGKey(0)
    kx, kp = jax.random.split(key)

    B, Cin, H, W = 2, 4, 16, 16
    Cout, ratio = 8, 2

    x = jax.random.normal(kx, (B, Cin, H, W), jnp.float32)
    params = make_params(kp, Cin, Cout, ratio)
    ref = reference(x, params)

    # Fused single-pass path (default).
    out_fused = jax.block_until_ready(channel_attention(x, params))
    assert out_fused.shape == (B, Cout, H, W)
    assert jnp.allclose(out_fused.astype(jnp.float32), ref,
                        atol=5e-3, rtol=5e-3), "fused path mismatch"

    # Two-pass fallback path.
    out_2p = jax.block_until_ready(
        channel_attention(x, params, force_two_pass=True))
    assert jnp.allclose(out_2p.astype(jnp.float32), ref,
                        atol=5e-3, rtol=5e-3), "two-pass path mismatch"

    # Non-128-multiple spatial extent (wrapper pad + masked max pooling).
    x2 = jax.random.normal(kx, (1, Cin, 9, 9), jnp.float32)
    ref2 = reference(x2, params)
    out2 = jax.block_until_ready(channel_attention(x2, params))
    assert out2.shape == (1, Cout, 9, 9)
    assert jnp.allclose(out2.astype(jnp.float32), ref2,
                        atol=5e-3, rtol=5e-3), "ragged-HW path mismatch"

    print("KERNEL_OK")
</pallas_src>

<mosaic_0001>
module attributes {stable_mosaic.version = 11 : i64} {
  func.func @_fused_kernel(%arg0: i32, %arg1: i32, %arg2: memref<1x4x256xf32, #tpu.memory_space<vmem>>, %arg3: memref<8x4xbf16, #tpu.memory_space<vmem>>, %arg4: memref<8x4xbf16, #tpu.memory_space<vmem>>, %arg5: memref<8x4xbf16, #tpu.memory_space<vmem>>, %arg6: memref<8x4xbf16, #tpu.memory_space<vmem>>, %arg7: memref<8x4xbf16, #tpu.memory_space<vmem>>, %arg8: memref<1x8x256xbf16, #tpu.memory_space<vmem>>, %arg9: memref<8x128xf32, #tpu.memory_space<vmem>>, %arg10: memref<8x128xf32, #tpu.memory_space<vmem>>) attributes {dimension_semantics = [#tpu.dimension_semantics<parallel>, #tpu.dimension_semantics<arbitrary>], iteration_bounds = array<i64: 2, 1>, scalar_prefetch = 0 : i64, scratch_operands = 2 : i64, tpu.core_type = #tpu.core_type<tc>, window_params = [{transform_indices = @transform_0, window_bounds = array<i64: 1, 4, 256>}, {pipeline_mode = #tpu.pipeline_mode<synchronous>, transform_indices = @transform_1, window_bounds = array<i64: 8, 4>}, {pipeline_mode = #tpu.pipeline_mode<synchronous>, transform_indices = @transform_2, window_bounds = array<i64: 8, 4>}, {pipeline_mode = #tpu.pipeline_mode<synchronous>, transform_indices = @transform_3, window_bounds = array<i64: 8, 4>}, {pipeline_mode = #tpu.pipeline_mode<synchronous>, transform_indices = @transform_4, window_bounds = array<i64: 8, 4>}, {pipeline_mode = #tpu.pipeline_mode<synchronous>, transform_indices = @transform_5, window_bounds = array<i64: 8, 4>}, {transform_indices = @transform_6, window_bounds = array<i64: 1, 8, 256>}]} {
    %c0_i32 = arith.constant 0 : i32
    %0 = arith.cmpi eq, %arg1, %c0_i32 : i32
    %1 = arith.extui %0 : i1 to i32
    %c0_i32_0 = arith.constant 0 : i32
    %2 = arith.cmpi ne, %1, %c0_i32_0 : i32
    scf.if %2 {
      %cst_17 = arith.constant 0.000000e+00 : f32
      %30 = vector.broadcast %cst_17 : f32 to vector<8x128xf32>
      %c0_18 = arith.constant 0 : index
      %c0_19 = arith.constant 0 : index
      %31 = vector.load %arg9[%c0_18, %c0_19] : memref<8x128xf32, #tpu.memory_space<vmem>>, vector<8x128xf32>
      tpu.vector_store %arg9[%c0_18, %c0_19], %30 {strides = array<i32>} : memref<8x128xf32, #tpu.memory_space<vmem>>, vector<8x128xf32>,
      %cst_20 = arith.constant 0xFF800000 : f32
      %32 = vector.broadcast %cst_20 : f32 to vector<8x128xf32>
      %c0_21 = arith.constant 0 : index
      %c0_22 = arith.constant 0 : index
      %33 = vector.load %arg10[%c0_21, %c0_22] : memref<8x128xf32, #tpu.memory_space<vmem>>, vector<8x128xf32>
      tpu.vector_store %arg10[%c0_21, %c0_22], %32 {strides = array<i32>} : memref<8x128xf32, #tpu.memory_space<vmem>>, vector<8x128xf32>,
    } else {
    }
    %c0 = arith.constant 0 : index
    %c0_1 = arith.constant 0 : index
    %c0_2 = arith.constant 0 : index
    %3 = vector.load %arg2[%c0, %c0_1, %c0_2] : memref<1x4x256xf32, #tpu.memory_space<vmem>>, vector<1x4x256xf32>
    %4 = vector.shape_cast %3 : vector<1x4x256xf32> to vector<4x256xf32>
    %5 = arith.truncf %4 : vector<4x256xf32> to vector<4x256xbf16>
    %c0_3 = arith.constant 0 : index
    %c0_4 = arith.constant 0 : index
    %6 = vector.load %arg3[%c0_3, %c0_4] : memref<8x4xbf16, #tpu.memory_space<vmem>>, vector<8x4xbf16>
    %cst = arith.constant dense<0.000000e+00> : vector<8x256xf32>
    %7 = tpu.matmul %6, %5, %cst {dimension_numbers = #tpu.dot_dimension_numbers<[1], [0], [0], [1], [0, 0, 1, 1], [], []>} : vector<8x4xbf16>, vector<4x256xbf16>, vector<8x256xf32> -> vector<8x256xf32>
    %8 = vector.extract_strided_slice %7 {offsets = [0, 0], sizes = [8, 128], strides = [1, 1]} : vector<8x256xf32> to vector<8x128xf32>
    %9 = vector.extract_strided_slice %7 {offsets = [0, 0], sizes = [8, 128], strides = [1, 1]} : vector<8x256xf32> to vector<8x128xf32>
    %10 = vector.extract_strided_slice %7 {offsets = [0, 128], sizes = [8, 128], strides = [1, 1]} : vector<8x256xf32> to vector<8x128xf32>
    %11 = arith.addf %8, %10 : vector<8x128xf32>
    %12 = vector.extract_strided_slice %7 {offsets = [0, 128], sizes = [8, 128], strides = [1, 1]} : vector<8x256xf32> to vector<8x128xf32>
    %13 = arith.maximumf %9, %12 : vector<8x128xf32>
    %c0_5 = arith.constant 0 : index
    %c0_6 = arith.constant 0 : index
    %14 = vector.load %arg9[%c0_5, %c0_6] : memref<8x128xf32, #tpu.memory_space<vmem>>, vector<8x128xf32>
    %15 = arith.addf %14, %11 : vector<8x128xf32>
    %c0_7 = arith.constant 0 : index
    %c0_8 = arith.constant 0 : index
    %16 = vector.load %arg9[%c0_7, %c0_8] : memref<8x128xf32, #tpu.memory_space<vmem>>, vector<8x128xf32>
    tpu.vector_store %arg9[%c0_7, %c0_8], %15 {strides = array<i32>} : memref<8x128xf32, #tpu.memory_space<vmem>>, vector<8x128xf32>,
    %c0_9 = arith.constant 0 : index
    %c0_10 = arith.constant 0 : index
    %17 = vector.load %arg10[%c0_9, %c0_10] : memref<8x128xf32, #tpu.memory_space<vmem>>, vector<8x128xf32>
    %18 = arith.maximumf %17, %13 : vector<8x128xf32>
    %c0_11 = arith.constant 0 : index
    %c0_12 = arith.constant 0 : index
    %19 = vector.load %arg10[%c0_11, %c0_12] : memref<8x128xf32, #tpu.memory_space<vmem>>, vector<8x128xf32>
    tpu.vector_store %arg10[%c0_11, %c0_12], %18 {strides = array<i32>} : memref<8x128xf32, #tpu.memory_space<vmem>>, vector<8x128xf32>,
    %c256_i32 = arith.constant 256 : i32
    %20 = arith.muli %arg1, %c256_i32 : i32
    %21 = tpu.assume_multiple %20, 128 : i32
    %22 = arith.truncf %7 : vector<8x256xf32> to vector<8x256xbf16>
    %c0_13 = arith.constant 0 : index
    %c0_14 = arith.constant 0 : index
    %23 = arith.index_cast %21 : i32 to index
    %24 = vector.load %arg8[%c0_13, %c0_14, %23] : memref<1x8x256xbf16, #tpu.memory_space<vmem>>, vector<1x8x256xbf16>
    %25 = vector.shape_cast %24 : vector<1x8x256xbf16> to vector<8x256xbf16>
    %26 = vector.shape_cast %22 : vector<8x256xbf16> to vector<1x8x256xbf16>
    tpu.vector_store %arg8[%c0_13, %c0_14, %23], %26 {strides = array<i32>} : memref<1x8x256xbf16, #tpu.memory_space<vmem>>, vector<1x8x256xbf16>,
    %c0_i32_15 = arith.constant 0 : i32
    %27 = arith.cmpi eq, %arg1, %c0_i32_15 : i32
    %28 = arith.extui %27 : i1 to i32
    %c0_i32_16 = arith.constant 0 : i32
    %29 = arith.cmpi ne, %28, %c0_i32_16 : i32
    scf.if %29 {
      %c0_17 = arith.constant 0 : index
      %c0_18 = arith.constant 0 : index
      %30 = vector.load %arg9[%c0_17, %c0_18] : memref<8x128xf32, #tpu.memory_space<vmem>>, vector<8x128xf32>
      %cst_19 = arith.constant dense<0.000000e+00> : vector<8xf32>
      %31 = vector.multi_reduction <add>, %30, %cst_19 [1] : vector<8x128xf32> to vector<8xf32>
      %32 = vector.shape_cast %31 : vector<8xf32> to vector<8x1xf32>
      %cst_20 = arith.constant 3.906250e-03 : f32
      %33 = vector.broadcast %cst_20 : f32 to vector<8x1xf32>
      %34 = arith.mulf %32, %33 : vector<8x1xf32>
      %c0_21 = arith.constant 0 : index
      %c0_22 = arith.constant 0 : index
      %35 = vector.load %arg10[%c0_21, %c0_22] : memref<8x128xf32, #tpu.memory_space<vmem>>, vector<8x128xf32>
      %cst_23 = arith.constant dense<0xFF800000> : vector<8xf32>
      %36 = vector.multi_reduction <maximumf>, %35, %cst_23 [1] : vector<8x128xf32> to vector<8xf32>
      %37 = vector.shape_cast %36 : vector<8xf32> to vector<8x1xf32>
      %c0_24 = arith.constant 0 : index
      %c0_25 = arith.constant 0 : index
      %38 = vector.load %arg4[%c0_24, %c0_25] : memref<8x4xbf16, #tpu.memory_space<vmem>>, vector<8x4xbf16>
      %39 = arith.extf %38 : vector<8x4xbf16> to vector<8x4xf32>
      %40 = vector.broadcast %34 : vector<8x1xf32> to vector<8x4xf32>
      %41 = arith.mulf %39, %40 : vector<8x4xf32>
      %cst_26 = arith.constant dense<0.000000e+00> : vector<4xf32>
      %42 = vector.multi_reduction <add>, %41, %cst_26 [0] : vector<8x4xf32> to vector<4xf32>
      %43 = vector.shape_cast %42 : vector<4xf32> to vector<1x4xf32>
      %cst_27 = arith.constant 0.000000e+00 : f32
      %44 = vector.broadcast %cst_27 : f32 to vector<1x4xf32>
      %45 = arith.maximumf %43, %44 : vector<1x4xf32>
      %c0_28 = arith.constant 0 : index
      %c0_29 = arith.constant 0 : index
      %46 = vector.load %arg6[%c0_28, %c0_29] : memref<8x4xbf16, #tpu.memory_space<vmem>>, vector<8x4xbf16>
      %47 = arith.extf %46 : vector<8x4xbf16> to vector<8x4xf32>
      %48 = vector.broadcast %37 : vector<8x1xf32> to vector<8x4xf32>
      %49 = arith.mulf %47, %48 : vector<8x4xf32>
      %cst_30 = arith.constant dense<0.000000e+00> : vector<4xf32>
      %50 = vector.multi_reduction <add>, %49, %cst_30 [0] : vector<8x4xf32> to vector<4xf32>
      %51 = vector.shape_cast %50 : vector<4xf32> to vector<1x4xf32>
      %cst_31 = arith.constant 0.000000e+00 : f32
      %52 = vector.broadcast %cst_31 : f32 to vector<1x4xf32>
      %53 = arith.maximumf %51, %52 : vector<1x4xf32>
      %c0_32 = arith.constant 0 : index
      %c0_33 = arith.constant 0 : index
      %54 = vector.load %arg5[%c0_32, %c0_33] : memref<8x4xbf16, #tpu.memory_space<vmem>>, vector<8x4xbf16>
      %55 = arith.extf %54 : vector<8x4xbf16> to vector<8x4xf32>
      %56 = vector.broadcast %45 : vector<1x4xf32> to vector<8x4xf32>
      %57 = arith.mulf %55, %56 : vector<8x4xf32>
      %cst_34 = arith.constant dense<0.000000e+00> : vector<8xf32>
      %58 = vector.multi_reduction <add>, %57, %cst_34 [1] : vector<8x4xf32> to vector<8xf32>
      %59 = vector.shape_cast %58 : vector<8xf32> to vector<8x1xf32>
      %c0_35 = arith.constant 0 : index
      %c0_36 = arith.constant 0 : index
      %60 = vector.load %arg7[%c0_35, %c0_36] : memref<8x4xbf16, #tpu.memory_space<vmem>>, vector<8x4xbf16>
      %61 = arith.extf %60 : vector<8x4xbf16> to vector<8x4xf32>
      %62 = vector.broadcast %53 : vector<1x4xf32> to vector<8x4xf32>
      %63 = arith.mulf %61, %62 : vector<8x4xf32>
      %cst_37 = arith.constant dense<0.000000e+00> : vector<8xf32>
      %64 = vector.multi_reduction <add>, %63, %cst_37 [1] : vector<8x4xf32> to vector<8xf32>
      %65 = vector.shape_cast %64 : vector<8xf32> to vector<8x1xf32>
      %66 = arith.addf %59, %65 : vector<8x1xf32>
      %67 = arith.negf %66 : vector<8x1xf32>
      %68 = math.exp %67 : vector<8x1xf32>
      %cst_38 = arith.constant 1.000000e+00 : f32
      %69 = vector.broadcast %cst_38 : f32 to vector<8x1xf32>
      %70 = arith.addf %69, %68 : vector<8x1xf32>
      %71 = arith.divf %69, %70 : vector<8x1xf32>
      %c0_i32_39 = arith.constant 0 : i32
      %c1_i32 = arith.constant 1 : i32
      %72 = arith.muli %c0_i32_39, %c1_i32 : i32
      %c0_i32_40 = arith.constant 0 : i32
      %73 = arith.addi %c0_i32_40, %72 : i32
      %c256_i32_41 = arith.constant 256 : i32
      %74 = arith.muli %73, %c256_i32_41 : i32
      %75 = tpu.assume_multiple %74, 128 : i32
      %c0_42 = arith.constant 0 : index
      %c0_43 = arith.constant 0 : index
      %76 = arith.index_cast %75 : i32 to index
      %77 = vector.load %arg8[%c0_42, %c0_43, %76] : memref<1x8x256xbf16, #tpu.memory_space<vmem>>, vector<1x8x256xbf16>
      %78 = vector.shape_cast %77 : vector<1x8x256xbf16> to vector<8x256xbf16>
      %79 = arith.extf %78 : vector<8x256xbf16> to vector<8x256xf32>
      %80 = vector.broadcast %71 : vector<8x1xf32> to vector<8x256xf32>
      %81 = arith.mulf %79, %80 : vector<8x256xf32>
      %82 = arith.truncf %81 : vector<8x256xf32> to vector<8x256xbf16>
      %c0_44 = arith.constant 0 : index
      %c0_45 = arith.constant 0 : index
      %83 = arith.index_cast %75 : i32 to index
      %84 = vector.load %arg8[%c0_44, %c0_45, %83] : memref<1x8x256xbf16, #tpu.memory_space<vmem>>, vector<1x8x256xbf16>
      %85 = vector.shape_cast %84 : vector<1x8x256xbf16> to vector<8x256xbf16>
      %86 = vector.shape_cast %82 : vector<8x256xbf16> to vector<1x8x256xbf16>
      tpu.vector_store %arg8[%c0_44, %c0_45, %83], %86 {strides = array<i32>} : memref<1x8x256xbf16, #tpu.memory_space<vmem>>, vector<1x8x256xbf16>,
      %c1_i32_46 = arith.constant 1 : i32
    } else {
    }
    return
  }
  func.func @transform_0(%arg0: i32, %arg1: i32) -> (i32, i32, i32) {
    %c0_i32 = arith.constant 0 : i32
    %c0_i32_0 = arith.constant 0 : i32
    return %arg0, %c0_i32, %arg1 : i32, i32, i32
  }
  func.func @transform_1(%arg0: i32, %arg1: i32) -> (i32, i32) {
    %c0_i32 = arith.constant 0 : i32
    %c0_i32_0 = arith.constant 0 : i32
    %c0_i32_1 = arith.constant 0 : i32
    return %c0_i32, %c0_i32_0 : i32, i32
  }
  func.func @transform_2(%arg0: i32, %arg1: i32) -> (i32, i32) {
    %c0_i32 = arith.constant 0 : i32
    %c0_i32_0 = arith.constant 0 : i32
    %c0_i32_1 = arith.constant 0 : i32
    return %c0_i32, %c0_i32_0 : i32, i32
  }
  func.func @transform_3(%arg0: i32, %arg1: i32) -> (i32, i32) {
    %c0_i32 = arith.constant 0 : i32
    %c0_i32_0 = arith.constant 0 : i32
    %c0_i32_1 = arith.constant 0 : i32
    return %c0_i32, %c0_i32_0 : i32, i32
  }
  func.func @transform_4(%arg0: i32, %arg1: i32) -> (i32, i32) {
    %c0_i32 = arith.constant 0 : i32
    %c0_i32_0 = arith.constant 0 : i32
    %c0_i32_1 = arith.constant 0 : i32
    return %c0_i32, %c0_i32_0 : i32, i32
  }
  func.func @transform_5(%arg0: i32, %arg1: i32) -> (i32, i32) {
    %c0_i32 = arith.constant 0 : i32
    %c0_i32_0 = arith.constant 0 : i32
    %c0_i32_1 = arith.constant 0 : i32
    return %c0_i32, %c0_i32_0 : i32, i32
  }
  func.func @transform_6(%arg0: i32, %arg1: i32) -> (i32, i32, i32) {
    %c0_i32 = arith.constant 0 : i32
    %c0_i32_0 = arith.constant 0 : i32
    %c0_i32_1 = arith.constant 0 : i32
    return %arg0, %c0_i32, %c0_i32_0 : i32, i32, i32
  }
}

</mosaic_0001>

<bundles_post_ra>
// kernel: tpu_custom_call.1
= control target key start
LH: loop header
LB: loop body
LE: loop exit
PB: predicated region body
PF: predicated region fallthrough
CT: control target
= control target key end

     0   :  { %11 = vsyncpa [#allocation5], 0  ;;  %s838_s0 = inlined_call_operand.vmem [shape: f32[2,4,256], index: 0, kind: input, shape index: {}]   ;;  %s839_s1 = inlined_call_operand.vmem [shape: bf16[8,4], index: 1, kind: input, shape index: {}]   ;;  %s840_s2 = inlined_call_operand.vmem [shape: bf16[8,4], index: 2, kind: input, shape index: {}]   ;;  %s841_s3 = inlined_call_operand.vmem [shape: bf16[8,4], index: 3, kind: input, shape index: {}]   ;;  %s842_s4 = inlined_call_operand.vmem [shape: bf16[8,4], index: 4, kind: input, shape index: {}]   ;;  %s843_s5 = inlined_call_operand.vmem [shape: bf16[8,4], index: 5, kind: input, shape index: {}]   ;;  %s844_s6 = inlined_call_operand.hbm [shape: bf16[2,8,256], index: 6, kind: output, shape index: {}]  }
   0x1   :  { %13 = vsyncpa [#allocation5 + $0x1], 0  ;;  %s719_s21 = smov 0   ;;  %s721_s22 = smov 0  }
   0x2   :  { %s723_s23 = smov 0   ;;  %s725_s24 = smov 0  }
   0x3   :  { %s727_s25 = smov 0   ;;  %s729_s26 = smov 0  }
   0x4 LB: > { %s521_s27 = sadd.s32 4294967295, %s680_s26   ;;  %s522_s28 = sadd.s32 4294967294, %s680_s26   ;;  %s680_s26 = sphi %s729_s26, %s19_s26   ;;  %s676_s25 = sphi %s727_s25, %s851_s25   ;;  %s672_s24 = sphi %s725_s24, %s850_s24   ;;  %s668_s23 = sphi %s723_s23, %s849_s23   ;;  %s664_s22 = sphi %s721_s22, %s848_s22   ;;  %s660_s21 = sphi %s719_s21, %s847_s21  }
   0x5   : > { %s31_s29 = sadd.s32 1, %s676_s25  ;;  %s171_s30 = sadd.s32 1, %s668_s23 }
   0x6   : > { %p33_p0 = scmp.ge.s32.totalorder %s31_s29, 2  ;;  %p181_p1 = scmp.ne.s32.totalorder %s668_s23, %s664_s22 }
   0x7   : > { %p182_p2 = scmp.eq.s32.totalorder %s521_s27, 1  ;;  %p187_p3 = scmp.ne.s32.totalorder %s664_s22, %s660_s21 }
   0x8   : > { %s853_s29 = smov (%p33_p0, %s31_s29), 0  ;;  %p188_p5 = scmp.eq.s32.totalorder %s522_s28, 1 }
   0x9   : > { %p759_p4 = por %p182_p2, %p181_p1  ;;  %s168_s8 = ssub.s32 %s676_s25, %s853_s29 }
   0xa   : > { %p525_p6 = scmp.ge.s32.totalorder %s680_s26, 1  ;;  %p169_p7 = scmp.eq.s32.totalorder %s168_s8, 0 }
   0xb   : > { %p766_p8 = por %p188_p5, %p187_p3  ;;  %p234_p9 = scmp.lt.s32.totalorder %s680_s26, 3 }
   0xc   : > { %s772_s10 = scalar_select %p169_p7, %s668_s23, %s171_s30  }
   0xd   : > { %p235_p10 = pnand %p525_p6, %p234_p9 }
   0xe   : > { %p269_p11 = scmp.lt.s32.totalorder (!%p235_p10), %s672_s24, 1  ;;  %s542_s14 = sshll.u32 (!%p235_p10), %s672_s24, 7 }
   0xf   : > { %238 = sbr.rel (%p235_p10) target bundleno = 583 (0x247), region = 44  ;;  %s444_s19 = scalar_lea.hbm (!%p235_p10), %s844_s6, %s542_s14 }
  0x10   : > { %s683_s28 = smov (!%p235_p10), [#allocation4]  }
  0x11   : > { %s608_s30 = sshll.u32 (!%p235_p10), %s683_s28, 4  ;;  %s609_s30 = int_to_ptr.vmem [resolvable:$false] %s608_s30 }
  0x14   : > { %v682_v0 = vmov 0   ;;  %s270_s11 = scalar_select %p269_p11, %s672_s24, 1  ;;  %vm296_vm0 = vcmask 1041408   ;;  %v291_v6 = vld [vmem:[%s839_s1] sm:$0xf]  ;;  %vm292_vm1 = vcmask 31744  }
  0x15   : > { %335 = vmatprep.mubr.bf16.mxu0 %v682_v0  ;;  %v376_v14 = vld [vmem:[%s840_s2] sm:$0xf]  ;;  %s610_s24 = scalar_lea.vmem %s609_s30, 256 }
  0x16   : > { %s539_s12 = sshll.u32 %s270_s11, 3  ;;  %v387_v15 = vld [vmem:[%s842_s4] sm:$0xf]  ;;  %v377_v16 = vunpack.c.l.bf16 %v376_v14 }
  0x17   : > { %s276_s15 = scalar_lea.vmem %s838_s0, %s539_s12  ;;  %v388_v19 = vunpack.c.l.bf16 %v387_v15  ;;  %v398_v32 = vld [vmem:[%s841_s3] sm:$0xf]  ;;  %s265_s12 = sand.u32 1, %s664_s22  }
  0x18   : > { %v285_v1 = vld [vmem:[%s276_s15] sm:$0xff]  ;;  %v399_v37 = vunpack.c.l.bf16 %v398_v32  ;;  %s526_s13 = sshll.u32 %s265_s12, 3  ;;  %s432_s20 = scalar_lea.sflag [#allocation5], %s265_s12 }
  0x19   : > { %v287_v2 = vcombine.high %v285_v1, %v285_v1  ;;  %v289_v3 = vpack.c.bf16 %v285_v1, %v285_v1  ;;  %v404_v35 = vld [vmem:[%s843_s5] sm:$0xf]  ;;  %s267_s15 = scalar_lea.vmem [#allocation4], %s526_s13 }
  0x1a   : > { %v405_v41 = vunpack.c.l.bf16 %v404_v35  ;;  %s446_s16 = sshll.u32 %s267_s15, 4  ;;  %s447_s16 = int_to_ptr.vmem [resolvable:$true] %s446_s16 }
  0x1b   : > { %v290_v4 = vpack.c.bf16 %v287_v2, %v287_v2  ;;  %v298_v5 = vsel %vm296_vm0, %v289_v3, 0  ;;  %s604_s27 = scalar_lea.vmem %s447_s16, 128  ;;  %p611_p1 = scmp.lt.s32.totalorder %s447_s16, %s609_s30 }
  0x1c   : > { %p605_p12 = scmp.ne.s32.totalorder %s447_s16, %s604_s27  ;;  %p612_p2 = scmp.lt.s32.totalorder %s610_s24, %s604_s27 }
  0x1d   : > { %529 = vmatprep.subr.msk.bf16.mxu0 %vm296_vm0, %v290_v4 }
  0x1e   : > { %318 = vmatpush1.bf16.msra.mxu0 %v298_v5  ;;  %p606_p13 = pnand %p605_p12, %p759_p4  ;;  %p613_p3 = por %p612_p2, %p611_p1 }
  0x20   : > { %p607_p0 = pneg %p606_p13 }
  0x21   : > { %530 = vmatmul.mubr.msk.bf16.vlgmr.msra.gmra.mxu0 %vm292_vm1, %v291_v6 }
  0x22   : > { %p614_p5 = pnand %p613_p3, %p607_p0 }
  0xe1   : > { %v337_v7 = vpop.f32.mrf.mxu0 }
  0xe3   : > { %v339_v8 = vpop.f32.mrf.mxu0 }
  0xe4   : > { %v540_v9 = vpack.c.bf16 %v339_v8, %v337_v7  ;;  %v344_v10 = vadd.f32 %v339_v8, %v337_v7  ;;  %v345_v13 = vmax.f32 %v337_v7, %v339_v8 }
  0xe5   : > { %v341_v11 = vpop.f32.mrf.mxu0 }
  0xe6   : > { %370 = vadd.xlane.f32.xlu0 %v344_v10  ;;  %v418_v53 = vunpack.c.l.bf16 %v540_v9  ;;  %v419_v54 = vunpack.c.h.bf16 %v540_v9 }
  0xe7   : > { %v342_v12 = vpop.f32.mrf.mxu0 }
  0xea   : > { %374 = vmax.xlane.f32.xlu0 %v345_v13 }
 0x16f   : > { %v371_v17 = vpop.xlane.xlu0 %370 }
 0x170   : > { %v372_v18 = vmul.f32 0.00390625, %v371_v17 }
 0x172   : > { %v378_v20 = vmul.f32 %v377_v16, %v372_v18 }
 0x173   : > { %v375_v21 = vpop.xlane.xlu0 %374 }
 0x174   : > { %v379_v22 = vsel %vm292_vm1, %v378_v20, 0.0  ;;  %v389_v23 = vmul.f32 %v388_v19, %v375_v21 }
 0x175   : > { %v380_v24 = vrot.slane %v379_v22, 4 }
 0x176   : > { %v390_v25 = vsel %vm292_vm1, %v389_v23, 0.0 }
 0x177   : > { %v381_v26 = vadd.f32 %v380_v24, %v379_v22  ;;  %v391_v27 = vrot.slane %v390_v25, 4 }
 0x179   : > { %v382_v28 = vrot.slane %v381_v26, 2  ;;  %v392_v29 = vadd.f32 %v391_v27, %v390_v25 }
 0x17b   : > { %v393_v30 = vrot.slane %v392_v29, 2  ;;  %v383_v31 = vadd.f32 %v382_v28, %v381_v26 }
 0x17d   : > { %v394_v33 = vadd.f32 %v393_v30, %v392_v29  ;;  %v384_v34 = vrot.slane %v383_v31, 1 }
 0x17f   : > { %v385_v36 = vadd.f32 %v384_v34, %v383_v31  ;;  %v395_v38 = vrot.slane %v394_v33, 1 }
 0x181   : > { %v386_v39 = vmax.f32 %v385_v36, 0.0  ;;  %v396_v40 = vadd.f32 %v395_v38, %v394_v33 }
 0x183   : > { %v400_v42 = vmul.f32 %v399_v37, %v386_v39  ;;  %v397_v43 = vmax.f32 %v396_v40, 0.0 }
 0x185   : > { %v401_v44 = vsel %vm292_vm1, %v400_v42, 0.0  ;;  %v406_v45 = vmul.f32 %v405_v41, %v397_v43 }
 0x186   : > { %402 = vadd.xlane.f32.xlu1 %v401_v44 }
 0x187   : > { %v407_v46 = vsel %vm292_vm1, %v406_v45, 0.0 }
 0x18a   : > { %408 = vadd.xlane.f32.xlu1 %v407_v46 }
 0x20f   : > { %v403_v47 = vpop.xlane.xlu1 %402 }
 0x213   : > { %v409_v48 = vpop.xlane.xlu1 %408 }
 0x214   : > { %v410_v49 = vadd.f32 %v409_v48, %v403_v47 }
 0x216   : > { %v532_v50 = vmul.f32 -1.442695, %v410_v49 }
 0x218   : > { %600 = vpow2.f32 %v532_v50 }
 0x225   : > { %v601_v51 = vpop.eup %600 }
 0x226   : > { %v414_v52 = vadd.f32 1.0, %v601_v51 }
 0x228   : > { %602 = vrcp.f32 %v414_v52 }
 0x235   : > { %v603_v55 = vpop.eup %602 }
 0x236   : > { %v420_v56 = vmul.f32 %v603_v55, %v418_v53  ;;  %v421_v57 = vmul.f32 %v603_v55, %v419_v54 }
 0x238   : > { %v541_v58 = vpack.c.bf16 %v421_v57, %v420_v56 }
 0x23a   : > { %430 = vst [vmem:[%s267_s15] sm:$0xff] %v541_v58 }
 0x23b   : > { %617 = shalt.err (!%p614_p5)
}
 0x23c   : > { %s618_s8 = scalar_lea.hbm %s444_s19, 128  ;;  %s622_s13 = scalar_lea.hbm %s844_s6, 256 }
 0x23d   : > { %p619_p6 = scmp.ne.s32.totalorder %s444_s19, %s618_s8  ;;  %p623_p10 = scmp.lt.s32.totalorder %s444_s19, %s844_s6 }
 0x23e   : > { %p624_p11 = scmp.lt.s32.totalorder %s622_s13, %s618_s8 }
 0x23f   : > { %p620_p7 = pnand %p619_p6, %p759_p4 }
 0x240   : > { %p625_p12 = por %p624_p11, %p623_p10 }
 0x241   : > { %p621_p9 = pneg %p620_p7 }
 0x243   : > { %p626_p13 = pnand %p625_p12, %p621_p9 }
 0x245   : > { %629 = shalt.err (!%p626_p13)
}
 0x246   : > { %543 = dma.vmem_to_hbm [thread:$0]  (%p759_p4), %s447_s16, 128, %s444_s19, %s432_s20  }
 0x247 PF: > { %p549_p0 = scmp.ge.s32.totalorder %s680_s26, 2  ;;  %s458_s17 = sand.u32 1, %s660_s21  }
 0x248   : > { %s459_s18 = scalar_lea.sflag [#allocation5], %s458_s17 }
 0x249   : > { %p546_p1 = pnand %p549_p0, %p766_p8 }
 0x24b   : > { %p547_p2 = pneg %p546_p1 }
 0x24d   : > { %655 = dma.done.wait (%p547_p2), %s459_s18, 128  }
 0x24e   : > { %657 = vsyncadd (%p547_p2), %s459_s18, 4294967168  ;;  %s19_s26 = sadd.s32 1, %s680_s26   ;;  %s847_s21 = smov %s664_s22 }
 0x24f   : > { %p16_p3 = scmp.ge.s32.totalorder %s19_s26, 4   ;;  %s848_s22 = smov %s668_s23 }
 0x250   : > { %s849_s23 = smov %s772_s10  ;;  %s850_s24 = smov %s676_s25 }
 0x251   : > { %s851_s25 = smov %s853_s29  ;;  %18 = sbr.rel (!%p16_p3) target bundleno = 4 (0x4), region = 88 }
 0x256   :  { %464 = vsyncpa [#allocation5], 1 }
 0x257   :  { %466 = vsyncpa [#allocation5 + $0x1], 1 }

</bundles_post_ra>
